<compile_context>
chip_gen: v5e
topology: v5e:2x2
jax: 0.10.0
libtpu: 0.0.40
codegen_flags: <defaults>
</compile_context>

<pallas_src>
import functools
import math

import jax
import jax.numpy as jnp
from jax import lax
from jax.experimental import pallas as pl
from jax.experimental.pallas import tpu as pltpu

LANE = 128


def _round_up(x, m=LANE):
    return ((x + m - 1) // m) * m


def _pad2d(x, rows, cols):
    r, c = x.shape
    return jnp.pad(x, ((0, rows - r), (0, cols - c)))


def _full_spec(shape):
    # block == full (2-D) array, single grid point.
    return pl.BlockSpec(shape, lambda i: (0, 0))


# ----------------------------------------------------------------------------
# Fused Pallas kernel: embedding gather + all GCN layers + MLP readout
# ----------------------------------------------------------------------------
def fused_gcn_kernel(*refs, n_gcn: int, residual: tuple):
    # refs = (ids, emb, a, [w_l, b_l] * n_gcn, [w_i, b_i] * 3 (MLP), out)
    ids_ref, emb_ref, a_ref = refs[0], refs[1], refs[2]
    gcn_refs = refs[3:3 + 2 * n_gcn]
    mlp_refs = refs[3 + 2 * n_gcn:-1]
    out_ref = refs[-1]

    n = ids_ref.shape[0]
    vocab = emb_ref.shape[0]

    # Embedding lookup as one-hot @ table (exact row selection, MXU-friendly, f32).
    ids = ids_ref[...]                                                       # (N, 1) int32
    onehot = (ids == lax.broadcasted_iota(jnp.int32, (n, vocab), 1)).astype(jnp.float32)
    h = jnp.dot(onehot, emb_ref[...], preferred_element_type=jnp.float32)    # (N, Hp) f32
    # in_feat_dropout: eval mode -> identity.

    a = a_ref[...]                                                           # (N, N) bf16
    for l in range(n_gcn):
        w = gcn_refs[2 * l][...]                                             # (Dp_in, Dp_out) bf16, BN-folded
        b = gcn_refs[2 * l + 1][...]                                         # (1, Dp_out) f32, BN-folded
        # H @ W' on the MXU (bf16 in, f32 acc), then aggregate with A_norm.
        hw = jnp.dot(h.astype(jnp.bfloat16), w, preferred_element_type=jnp.float32)
        z = jnp.dot(a, hw.astype(jnp.bfloat16), preferred_element_type=jnp.float32)
        z = jnp.maximum(z + b, 0.0)                                          # bias + ReLU, f32 epilogue
        h = h + z if residual[l] else z                                      # residual (static flag)
        # dropout: eval mode -> identity.

    # MLPReadout (L=2): Linear -> ReLU -> Linear -> ReLU -> Linear (all lane-padded, in-register)
    y = h
    n_mlp = len(mlp_refs) // 2
    for i in range(n_mlp):
        w = mlp_refs[2 * i][...]
        b = mlp_refs[2 * i + 1][...]
        y = jnp.dot(y.astype(jnp.bfloat16), w, preferred_element_type=jnp.float32) + b
        if i < n_mlp - 1:
            y = jnp.maximum(y, 0.0)

    out_ref[...] = y.astype(out_ref.dtype)                                   # lane-dense (N, 128) store


# ----------------------------------------------------------------------------
# Trace-time preprocessing + pallas_call wrapper
# ----------------------------------------------------------------------------
def _fold_bn(w, b, gamma, beta, mean, var, eps=1e-5):
    """Fold eval-mode BatchNorm1d into the linear weight/bias (per output column)."""
    scale = gamma * lax.rsqrt(var + eps)                 # (1, dout)
    return w * scale, (b - mean) * scale + beta


def gcn_net_forward(params, a_norm, node_ids):
    """Full GCNNet forward (eval mode, p=None) as one fused pallas_call."""
    n = node_ids.shape[0]
    node_ids = node_ids.reshape(n, 1).astype(jnp.int32)  # torch.squeeze handled by one-hot gather

    emb = params["emb"]
    vocab, hidden = emb.shape
    hp = _round_up(hidden)

    # ---- trace-time parameter preprocessing (BN fold, 128-lane zero pad, bf16 cast) ----
    emb_p = _pad2d(emb, vocab, hp)                                       # (V, Hp) f32 (exact gather)
    a_bf16 = a_norm.astype(jnp.bfloat16)                                 # (N, N) bf16 MXU operand

    gcn_args, residual = [], []
    for layer in params["gcn"]:
        din, dout = layer["w"].shape
        w_f, b_f = _fold_bn(layer["w"], layer["b"], layer["gamma"], layer["beta"],
                            layer["mean"], layer["var"])
        gcn_args.append(_pad2d(w_f, _round_up(din), _round_up(dout)).astype(jnp.bfloat16))
        gcn_args.append(_pad2d(b_f, 1, _round_up(dout)).astype(jnp.float32))
        residual.append(din == dout)                                     # static (from shapes)

    mlp_args = []
    for layer in params["mlp"]:
        din, dout = layer["w"].shape
        mlp_args.append(_pad2d(layer["w"], _round_up(din), _round_up(dout)).astype(jnp.bfloat16))
        mlp_args.append(_pad2d(layer["b"], 1, _round_up(dout)).astype(jnp.float32))

    out_dim = params["mlp"][-1]["w"].shape[1]
    op = _round_up(out_dim)

    inputs = [node_ids, emb_p, a_bf16] + gcn_args + mlp_args
    in_specs = [_full_spec(x.shape) for x in inputs]

    kernel = functools.partial(fused_gcn_kernel, n_gcn=len(params["gcn"]),
                               residual=tuple(residual))

    out_p = pl.pallas_call(
        kernel,
        grid=(1,),
        in_specs=in_specs,
        out_specs=_full_spec((n, op)),
        out_shape=jax.ShapeDtypeStruct((n, op), jnp.float32),
        compiler_params=pltpu.CompilerParams(dimension_semantics=("arbitrary",)),
    )(*inputs)

    # Drop the lane padding; torch.squeeze(h_out) leaves (N, out_dim) unchanged for out_dim > 1.
    return out_p[:, :out_dim]


# ----------------------------------------------------------------------------
# Model parameter construction (eval-mode BN stats) and example graph
# ----------------------------------------------------------------------------
def init_params(key, node_len, hidden_dim, out_dim, n_layers):
    params = {}
    keys = jax.random.split(key, 3 + 4 * n_layers)
    ki = iter(keys)

    # Embedding(in_dim_node, hidden_dim): torch default N(0, 1)
    params["emb"] = jax.random.normal(next(ki), (node_len, hidden_dim), jnp.float32)

    # GCN layers: (n_layers - 1) x [hidden -> hidden], then [hidden -> out_dim]
    dims = [(hidden_dim, hidden_dim)] * (n_layers - 1) + [(hidden_dim, out_dim)]
    params["gcn"] = []
    for (din, dout) in dims:
        kw, kb, kg, km = jax.random.split(next(ki), 4)
        bound = 1.0 / math.sqrt(din)
        params["gcn"].append({
            "w": jax.random.uniform(kw, (din, dout), jnp.float32, -bound, bound),
            "b": jax.random.uniform(kb, (1, dout), jnp.float32, -bound, bound),
            # BatchNorm1d eval-mode parameters (deterministic, mildly non-trivial).
            "gamma": 1.0 + 0.01 * jnp.arange(dout, dtype=jnp.float32)[None, :],
            "beta": 0.01 * jnp.arange(dout, dtype=jnp.float32)[None, :],
            "mean": 0.05 * jax.random.normal(kg, (1, dout), jnp.float32),
            "var": 1.0 + 0.05 * jax.random.uniform(km, (1, dout), jnp.float32),
        })

    # MLPReadout(out_dim, out_dim), L=2: out_dim -> out_dim//2 -> out_dim//4 -> out_dim
    mlp_dims = [(out_dim, out_dim // 2), (out_dim // 2, out_dim // 4), (out_dim // 4, out_dim)]
    params["mlp"] = []
    for (din, dout) in mlp_dims:
        kw, kb = jax.random.split(next(ki), 2)
        bound = 1.0 / math.sqrt(din)
        params["mlp"].append({
            "w": jax.random.uniform(kw, (din, dout), jnp.float32, -bound, bound),
            "b": jax.random.uniform(kb, (1, dout), jnp.float32, -bound, bound),
        })
    return params


def build_normalized_adjacency(n):
    """Ring graph + self-loops, symmetrically normalized: D^{-1/2} (A + I) D^{-1/2}."""
    idx = jnp.arange(n)
    a = jnp.zeros((n, n), jnp.float32)
    a = a.at[idx, (idx + 1) % n].set(1.0)
    a = a.at[(idx + 1) % n, idx].set(1.0)
    a = a + jnp.eye(n, dtype=jnp.float32)
    deg = jnp.sum(a, axis=1)
    d_inv_sqrt = 1.0 / jnp.sqrt(deg)
    return a * d_inv_sqrt[:, None] * d_inv_sqrt[None, :]


# ----------------------------------------------------------------------------
# Main
# ----------------------------------------------------------------------------
if __name__ == "__main__":
    # Small config consistent with the module's __init__:
    NODE_LEN = 16      # in_dim_node (embedding vocabulary of node labels)
    HIDDEN = 32        # args.gcn_hidden_dim
    OUT_DIM = 32       # out_dim
    N_LAYERS = 2       # args.gcn_num_layers
    N_NODES = 64       # number of graph nodes in the batch

    key = jax.random.PRNGKey(0)
    k_in, k_par = jax.random.split(key)

    # Inputs: integer node-label ids shaped (N, 1) (module squeezes them), plus the graph.
    node_ids = jax.random.randint(k_in, (N_NODES, 1), 0, NODE_LEN, dtype=jnp.int32)
    a_norm = build_normalized_adjacency(N_NODES)
    params = init_params(k_par, NODE_LEN, HIDDEN, OUT_DIM, N_LAYERS)

    # TODO(synk): positional-encoding branch (p is not None) uses per-graph permutation
    # scatter; not implemented since the forward is exercised with p=None.
    fwd = jax.jit(gcn_net_forward)
    out = jax.block_until_ready(fwd(params, a_norm, node_ids))

    assert out.shape == (N_NODES, OUT_DIM), out.shape
    assert bool(jnp.all(jnp.isfinite(out)))
    print("KERNEL_OK")
</pallas_src>

<mosaic_0001>
module attributes {stable_mosaic.version = 11 : i64} {
  func.func @fused_gcn_kernel(%arg0: i32, %arg1: memref<64x1xi32, #tpu.memory_space<vmem>>, %arg2: memref<16x128xf32, #tpu.memory_space<vmem>>, %arg3: memref<64x64xbf16, #tpu.memory_space<vmem>>, %arg4: memref<128x128xbf16, #tpu.memory_space<vmem>>, %arg5: memref<1x128xf32, #tpu.memory_space<vmem>>, %arg6: memref<128x128xbf16, #tpu.memory_space<vmem>>, %arg7: memref<1x128xf32, #tpu.memory_space<vmem>>, %arg8: memref<128x128xbf16, #tpu.memory_space<vmem>>, %arg9: memref<1x128xf32, #tpu.memory_space<vmem>>, %arg10: memref<128x128xbf16, #tpu.memory_space<vmem>>, %arg11: memref<1x128xf32, #tpu.memory_space<vmem>>, %arg12: memref<128x128xbf16, #tpu.memory_space<vmem>>, %arg13: memref<1x128xf32, #tpu.memory_space<vmem>>, %arg14: memref<64x128xf32, #tpu.memory_space<vmem>>) attributes {dimension_semantics = [#tpu.dimension_semantics<arbitrary>], iteration_bounds = array<i64: 1>, scalar_prefetch = 0 : i64, scratch_operands = 0 : i64, tpu.core_type = #tpu.core_type<tc>, window_params = [{pipeline_mode = #tpu.pipeline_mode<synchronous>, transform_indices = @transform_0, window_bounds = array<i64: 64, 1>}, {pipeline_mode = #tpu.pipeline_mode<synchronous>, transform_indices = @transform_1, window_bounds = array<i64: 16, 128>}, {pipeline_mode = #tpu.pipeline_mode<synchronous>, transform_indices = @transform_2, window_bounds = array<i64: 64, 64>}, {pipeline_mode = #tpu.pipeline_mode<synchronous>, transform_indices = @transform_3, window_bounds = array<i64: 128, 128>}, {pipeline_mode = #tpu.pipeline_mode<synchronous>, transform_indices = @transform_4, window_bounds = array<i64: 1, 128>}, {pipeline_mode = #tpu.pipeline_mode<synchronous>, transform_indices = @transform_5, window_bounds = array<i64: 128, 128>}, {pipeline_mode = #tpu.pipeline_mode<synchronous>, transform_indices = @transform_6, window_bounds = array<i64: 1, 128>}, {pipeline_mode = #tpu.pipeline_mode<synchronous>, transform_indices = @transform_7, window_bounds = array<i64: 128, 128>}, {pipeline_mode = #tpu.pipeline_mode<synchronous>, transform_indices = @transform_8, window_bounds = array<i64: 1, 128>}, {pipeline_mode = #tpu.pipeline_mode<synchronous>, transform_indices = @transform_9, window_bounds = array<i64: 128, 128>}, {pipeline_mode = #tpu.pipeline_mode<synchronous>, transform_indices = @transform_10, window_bounds = array<i64: 1, 128>}, {pipeline_mode = #tpu.pipeline_mode<synchronous>, transform_indices = @transform_11, window_bounds = array<i64: 128, 128>}, {pipeline_mode = #tpu.pipeline_mode<synchronous>, transform_indices = @transform_12, window_bounds = array<i64: 1, 128>}, {pipeline_mode = #tpu.pipeline_mode<synchronous>, transform_indices = @transform_13, window_bounds = array<i64: 64, 128>}]} {
    %c0 = arith.constant 0 : index
    %c0_0 = arith.constant 0 : index
    %0 = vector.load %arg1[%c0, %c0_0] : memref<64x1xi32, #tpu.memory_space<vmem>>, vector<64x1xi32>
    %1 = tpu.iota {dimensions = array<i32: 1>} : vector<64x16xi32>
    %2 = vector.broadcast %0 : vector<64x1xi32> to vector<64x16xi32>
    %3 = arith.cmpi eq, %2, %1 : vector<64x16xi32>
    %4 = arith.extui %3 : vector<64x16xi1> to vector<64x16xi32>
    %5 = arith.sitofp %4 : vector<64x16xi32> to vector<64x16xf32>
    %c0_1 = arith.constant 0 : index
    %c0_2 = arith.constant 0 : index
    %6 = vector.load %arg2[%c0_1, %c0_2] : memref<16x128xf32, #tpu.memory_space<vmem>>, vector<16x128xf32>
    %cst = arith.constant dense<0.000000e+00> : vector<64x128xf32>
    %7 = tpu.matmul %5, %6, %cst {dimension_numbers = #tpu.dot_dimension_numbers<[1], [0], [0], [1], [0, 0, 1, 1], [], []>} : vector<64x16xf32>, vector<16x128xf32>, vector<64x128xf32> -> vector<64x128xf32>
    %c0_3 = arith.constant 0 : index
    %c0_4 = arith.constant 0 : index
    %8 = vector.load %arg3[%c0_3, %c0_4] : memref<64x64xbf16, #tpu.memory_space<vmem>>, vector<64x64xbf16>
    %c0_5 = arith.constant 0 : index
    %c0_6 = arith.constant 0 : index
    %9 = vector.load %arg4[%c0_5, %c0_6] : memref<128x128xbf16, #tpu.memory_space<vmem>>, vector<128x128xbf16>
    %c0_7 = arith.constant 0 : index
    %c0_8 = arith.constant 0 : index
    %10 = vector.load %arg5[%c0_7, %c0_8] : memref<1x128xf32, #tpu.memory_space<vmem>>, vector<1x128xf32>
    %11 = arith.truncf %7 : vector<64x128xf32> to vector<64x128xbf16>
    %cst_9 = arith.constant dense<0.000000e+00> : vector<64x128xf32>
    %12 = tpu.matmul %11, %9, %cst_9 {dimension_numbers = #tpu.dot_dimension_numbers<[1], [0], [0], [1], [0, 0, 1, 1], [], []>} : vector<64x128xbf16>, vector<128x128xbf16>, vector<64x128xf32> -> vector<64x128xf32>
    %13 = arith.truncf %12 : vector<64x128xf32> to vector<64x128xbf16>
    %cst_10 = arith.constant dense<0.000000e+00> : vector<64x128xf32>
    %14 = tpu.matmul %8, %13, %cst_10 {dimension_numbers = #tpu.dot_dimension_numbers<[1], [0], [0], [1], [0, 0, 1, 1], [], []>} : vector<64x64xbf16>, vector<64x128xbf16>, vector<64x128xf32> -> vector<64x128xf32>
    %15 = vector.broadcast %10 : vector<1x128xf32> to vector<64x128xf32>
    %16 = arith.addf %14, %15 : vector<64x128xf32>
    %cst_11 = arith.constant 0.000000e+00 : f32
    %17 = vector.broadcast %cst_11 : f32 to vector<64x128xf32>
    %18 = arith.maximumf %16, %17 : vector<64x128xf32>
    %19 = arith.addf %7, %18 : vector<64x128xf32>
    %c0_12 = arith.constant 0 : index
    %c0_13 = arith.constant 0 : index
    %20 = vector.load %arg6[%c0_12, %c0_13] : memref<128x128xbf16, #tpu.memory_space<vmem>>, vector<128x128xbf16>
    %c0_14 = arith.constant 0 : index
    %c0_15 = arith.constant 0 : index
    %21 = vector.load %arg7[%c0_14, %c0_15] : memref<1x128xf32, #tpu.memory_space<vmem>>, vector<1x128xf32>
    %22 = arith.truncf %19 : vector<64x128xf32> to vector<64x128xbf16>
    %cst_16 = arith.constant dense<0.000000e+00> : vector<64x128xf32>
    %23 = tpu.matmul %22, %20, %cst_16 {dimension_numbers = #tpu.dot_dimension_numbers<[1], [0], [0], [1], [0, 0, 1, 1], [], []>} : vector<64x128xbf16>, vector<128x128xbf16>, vector<64x128xf32> -> vector<64x128xf32>
    %24 = arith.truncf %23 : vector<64x128xf32> to vector<64x128xbf16>
    %cst_17 = arith.constant dense<0.000000e+00> : vector<64x128xf32>
    %25 = tpu.matmul %8, %24, %cst_17 {dimension_numbers = #tpu.dot_dimension_numbers<[1], [0], [0], [1], [0, 0, 1, 1], [], []>} : vector<64x64xbf16>, vector<64x128xbf16>, vector<64x128xf32> -> vector<64x128xf32>
    %26 = vector.broadcast %21 : vector<1x128xf32> to vector<64x128xf32>
    %27 = arith.addf %25, %26 : vector<64x128xf32>
    %cst_18 = arith.constant 0.000000e+00 : f32
    %28 = vector.broadcast %cst_18 : f32 to vector<64x128xf32>
    %29 = arith.maximumf %27, %28 : vector<64x128xf32>
    %30 = arith.addf %19, %29 : vector<64x128xf32>
    %c0_19 = arith.constant 0 : index
    %c0_20 = arith.constant 0 : index
    %31 = vector.load %arg8[%c0_19, %c0_20] : memref<128x128xbf16, #tpu.memory_space<vmem>>, vector<128x128xbf16>
    %c0_21 = arith.constant 0 : index
    %c0_22 = arith.constant 0 : index
    %32 = vector.load %arg9[%c0_21, %c0_22] : memref<1x128xf32, #tpu.memory_space<vmem>>, vector<1x128xf32>
    %33 = arith.truncf %30 : vector<64x128xf32> to vector<64x128xbf16>
    %cst_23 = arith.constant dense<0.000000e+00> : vector<64x128xf32>
    %34 = tpu.matmul %33, %31, %cst_23 {dimension_numbers = #tpu.dot_dimension_numbers<[1], [0], [0], [1], [0, 0, 1, 1], [], []>} : vector<64x128xbf16>, vector<128x128xbf16>, vector<64x128xf32> -> vector<64x128xf32>
    %35 = vector.broadcast %32 : vector<1x128xf32> to vector<64x128xf32>
    %36 = arith.addf %34, %35 : vector<64x128xf32>
    %cst_24 = arith.constant 0.000000e+00 : f32
    %37 = vector.broadcast %cst_24 : f32 to vector<64x128xf32>
    %38 = arith.maximumf %36, %37 : vector<64x128xf32>
    %c0_25 = arith.constant 0 : index
    %c0_26 = arith.constant 0 : index
    %39 = vector.load %arg10[%c0_25, %c0_26] : memref<128x128xbf16, #tpu.memory_space<vmem>>, vector<128x128xbf16>
    %c0_27 = arith.constant 0 : index
    %c0_28 = arith.constant 0 : index
    %40 = vector.load %arg11[%c0_27, %c0_28] : memref<1x128xf32, #tpu.memory_space<vmem>>, vector<1x128xf32>
    %41 = arith.truncf %38 : vector<64x128xf32> to vector<64x128xbf16>
    %cst_29 = arith.constant dense<0.000000e+00> : vector<64x128xf32>
    %42 = tpu.matmul %41, %39, %cst_29 {dimension_numbers = #tpu.dot_dimension_numbers<[1], [0], [0], [1], [0, 0, 1, 1], [], []>} : vector<64x128xbf16>, vector<128x128xbf16>, vector<64x128xf32> -> vector<64x128xf32>
    %43 = vector.broadcast %40 : vector<1x128xf32> to vector<64x128xf32>
    %44 = arith.addf %42, %43 : vector<64x128xf32>
    %cst_30 = arith.constant 0.000000e+00 : f32
    %45 = vector.broadcast %cst_30 : f32 to vector<64x128xf32>
    %46 = arith.maximumf %44, %45 : vector<64x128xf32>
    %c0_31 = arith.constant 0 : index
    %c0_32 = arith.constant 0 : index
    %47 = vector.load %arg12[%c0_31, %c0_32] : memref<128x128xbf16, #tpu.memory_space<vmem>>, vector<128x128xbf16>
    %c0_33 = arith.constant 0 : index
    %c0_34 = arith.constant 0 : index
    %48 = vector.load %arg13[%c0_33, %c0_34] : memref<1x128xf32, #tpu.memory_space<vmem>>, vector<1x128xf32>
    %49 = arith.truncf %46 : vector<64x128xf32> to vector<64x128xbf16>
    %cst_35 = arith.constant dense<0.000000e+00> : vector<64x128xf32>
    %50 = tpu.matmul %49, %47, %cst_35 {dimension_numbers = #tpu.dot_dimension_numbers<[1], [0], [0], [1], [0, 0, 1, 1], [], []>} : vector<64x128xbf16>, vector<128x128xbf16>, vector<64x128xf32> -> vector<64x128xf32>
    %51 = vector.broadcast %48 : vector<1x128xf32> to vector<64x128xf32>
    %52 = arith.addf %50, %51 : vector<64x128xf32>
    %c0_36 = arith.constant 0 : index
    %c0_37 = arith.constant 0 : index
    %53 = vector.load %arg14[%c0_36, %c0_37] : memref<64x128xf32, #tpu.memory_space<vmem>>, vector<64x128xf32>
    tpu.vector_store %arg14[%c0_36, %c0_37], %52 {strides = array<i32>} : memref<64x128xf32, #tpu.memory_space<vmem>>, vector<64x128xf32>,
    return
  }
  func.func @transform_0(%arg0: i32) -> (i32, i32) {
    %c0_i32 = arith.constant 0 : i32
    %c0_i32_0 = arith.constant 0 : i32
    %c0_i32_1 = arith.constant 0 : i32
    return %c0_i32, %c0_i32_0 : i32, i32
  }
  func.func @transform_1(%arg0: i32) -> (i32, i32) {
    %c0_i32 = arith.constant 0 : i32
    %c0_i32_0 = arith.constant 0 : i32
    %c0_i32_1 = arith.constant 0 : i32
    return %c0_i32, %c0_i32_0 : i32, i32
  }
  func.func @transform_2(%arg0: i32) -> (i32, i32) {
    %c0_i32 = arith.constant 0 : i32
    %c0_i32_0 = arith.constant 0 : i32
    %c0_i32_1 = arith.constant 0 : i32
    return %c0_i32, %c0_i32_0 : i32, i32
  }
  func.func @transform_3(%arg0: i32) -> (i32, i32) {
    %c0_i32 = arith.constant 0 : i32
    %c0_i32_0 = arith.constant 0 : i32
    %c0_i32_1 = arith.constant 0 : i32
    return %c0_i32, %c0_i32_0 : i32, i32
  }
  func.func @transform_4(%arg0: i32) -> (i32, i32) {
    %c0_i32 = arith.constant 0 : i32
    %c0_i32_0 = arith.constant 0 : i32
    %c0_i32_1 = arith.constant 0 : i32
    return %c0_i32, %c0_i32_0 : i32, i32
  }
  func.func @transform_5(%arg0: i32) -> (i32, i32) {
    %c0_i32 = arith.constant 0 : i32
    %c0_i32_0 = arith.constant 0 : i32
    %c0_i32_1 = arith.constant 0 : i32
    return %c0_i32, %c0_i32_0 : i32, i32
  }
  func.func @transform_6(%arg0: i32) -> (i32, i32) {
    %c0_i32 = arith.constant 0 : i32
    %c0_i32_0 = arith.constant 0 : i32
    %c0_i32_1 = arith.constant 0 : i32
    return %c0_i32, %c0_i32_0 : i32, i32
  }
  func.func @transform_7(%arg0: i32) -> (i32, i32) {
    %c0_i32 = arith.constant 0 : i32
    %c0_i32_0 = arith.constant 0 : i32
    %c0_i32_1 = arith.constant 0 : i32
    return %c0_i32, %c0_i32_0 : i32, i32
  }
  func.func @transform_8(%arg0: i32) -> (i32, i32) {
    %c0_i32 = arith.constant 0 : i32
    %c0_i32_0 = arith.constant 0 : i32
    %c0_i32_1 = arith.constant 0 : i32
    return %c0_i32, %c0_i32_0 : i32, i32
  }
  func.func @transform_9(%arg0: i32) -> (i32, i32) {
    %c0_i32 = arith.constant 0 : i32
    %c0_i32_0 = arith.constant 0 : i32
    %c0_i32_1 = arith.constant 0 : i32
    return %c0_i32, %c0_i32_0 : i32, i32
  }
  func.func @transform_10(%arg0: i32) -> (i32, i32) {
    %c0_i32 = arith.constant 0 : i32
    %c0_i32_0 = arith.constant 0 : i32
    %c0_i32_1 = arith.constant 0 : i32
    return %c0_i32, %c0_i32_0 : i32, i32
  }
  func.func @transform_11(%arg0: i32) -> (i32, i32) {
    %c0_i32 = arith.constant 0 : i32
    %c0_i32_0 = arith.constant 0 : i32
    %c0_i32_1 = arith.constant 0 : i32
    return %c0_i32, %c0_i32_0 : i32, i32
  }
  func.func @transform_12(%arg0: i32) -> (i32, i32) {
    %c0_i32 = arith.constant 0 : i32
    %c0_i32_0 = arith.constant 0 : i32
    %c0_i32_1 = arith.constant 0 : i32
    return %c0_i32, %c0_i32_0 : i32, i32
  }
  func.func @transform_13(%arg0: i32) -> (i32, i32) {
    %c0_i32 = arith.constant 0 : i32
    %c0_i32_0 = arith.constant 0 : i32
    %c0_i32_1 = arith.constant 0 : i32
    return %c0_i32, %c0_i32_0 : i32, i32
  }
}

</mosaic_0001>

<bundles_post_ra>
// kernel: gcn_net_forward.1
= control target key start
LH: loop header
LB: loop body
LE: loop exit
PB: predicated region body
PF: predicated region fallthrough
CT: control target
= control target key end

     0   :  { %v1097_v0 = vmov 0   ;;  %v53_v11 = vlaneseq  ;;  %vm105_vm0 = vcmask 130048   ;;  %v1098_v14 = vmov 0.0   ;;  %s1466_s0 = inlined_call_operand.vmem [shape: s32[64,1], index: 0, kind: input, shape index: {}]   ;;  %s1467_s1 = inlined_call_operand.vmem [shape: f32[16,128], index: 1, kind: input, shape index: {}]   ;;  %s1468_s3 = inlined_call_operand.vmem [shape: bf16[128,128], index: 3, kind: input, shape index: {}]   ;;  %s1469_s4 = inlined_call_operand.vmem [shape: f32[1,128], index: 4, kind: input, shape index: {}]   ;;  %s1470_s2 = inlined_call_operand.vmem [shape: bf16[64,64], index: 2, kind: input, shape index: {}]   ;;  %s1471_s5 = inlined_call_operand.vmem [shape: bf16[128,128], index: 5, kind: input, shape index: {}]   ;;  %s1472_s6 = inlined_call_operand.vmem [shape: f32[1,128], index: 6, kind: input, shape index: {}]   ;;  %s1473_s7 = inlined_call_operand.vmem [shape: bf16[128,128], index: 7, kind: input, shape index: {}]   ;;  %s1474_s8 = inlined_call_operand.vmem [shape: f32[1,128], index: 8, kind: input, shape index: {}]   ;;  %s1475_s9 = inlined_call_operand.vmem [shape: bf16[128,128], index: 9, kind: input, shape index: {}]   ;;  %s1476_s10 = inlined_call_operand.vmem [shape: f32[1,128], index: 10, kind: input, shape index: {}]   ;;  %s1477_s11 = inlined_call_operand.vmem [shape: bf16[128,128], index: 11, kind: input, shape index: {}]   ;;  %s1478_s12 = inlined_call_operand.vmem [shape: f32[1,128], index: 12, kind: input, shape index: {}]   ;;  %s1479_s13 = inlined_call_operand.vmem [shape: f32[64,128], index: 13, kind: output, shape index: {}]  }
   0x1   :  { %1090 = vset.pattern.permute.xlu1 %v1097_v0  ;;  %1089 = vset.pattern.permute.xlu0 %v1097_v0  ;;  %v47_v1 = vld [vmem:[%s1466_s0 + $0x10] sm:$0xff]  ;;  %v45_v2 = vld [vmem:[%s1466_s0] sm:$0xff]  ;;  %v104_v4 = vld [vmem:[%s1467_s1 + $0x8] sm:$0xff]  ;;  %vm304_vm9 = vcmask 523264  }
   0x2   :  { %62 = vperm.xlu1 %1090, %v47_v1   ;;  %56 = vperm.xlu0 %1089, %v45_v2   ;;  %v49_v3 = vld [vmem:[%s1466_s0 + $0x20] sm:$0xff]  ;;  %v48_v5 = vld [vmem:[%s1466_s0 + $0x18] sm:$0xff]  ;;  %v46_v6 = vld [vmem:[%s1466_s0 + $0x8] sm:$0xff]  ;;  %v54_v12 = vand.u32 127, %v53_v11 }
   0x3   :  { %1091 = vset.pattern.permute.xlu2 %v1097_v0  ;;  %144 = vmatpush.msra.mxu0 %v104_v4  ;;  %v50_v7 = vld [vmem:[%s1466_s0 + $0x28] sm:$0xff]  ;;  %v52_v8 = vld [vmem:[%s1466_s0 + $0x38] sm:$0xff]  ;;  %v51_v9 = vld [vmem:[%s1466_s0 + $0x30] sm:$0xff] }
   0x4   :  { %68 = vperm.xlu2 %1091, %v49_v3   ;;  %v103_v10 = vld [vmem:[%s1467_s1] sm:$0xff]  ;;  %v1054_v23 = vld [vmem:[%s1468_s3 + $0x38] sm:$0xff]  ;;  %v1053_v24 = vld [vmem:[%s1468_s3 + $0x30] sm:$0xff] }
   0x5   :  { %145 = vmatpush.msra.mxu0 %v103_v10  ;;  %248 = vmatpush.bf16.msra.mxu1 %v1054_v23  ;;  %v1052_v26 = vld [vmem:[%s1468_s3 + $0x28] sm:$0xff]  ;;  %v1051_v28 = vld [vmem:[%s1468_s3 + $0x20] sm:$0xff]  ;;  %v1050_v29 = vld [vmem:[%s1468_s3 + $0x18] sm:$0xff] }
   0x6   :  { %v1049_v35 = vld [vmem:[%s1468_s3 + $0x10] sm:$0xff]  ;;  %v1048_v36 = vld [vmem:[%s1468_s3 + $0x8] sm:$0xff]  ;;  %v1047_v37 = vld [vmem:[%s1468_s3] sm:$0xff] }
   0x7   :  { %v1258_v62 = vld [vmem:[%s1470_s2] sm:$0xff]  ;;  %v1265_v63 = vld [vmem:[%s1470_s2 + $0x8] sm:$0xff]  ;;  %v1062_v0 = vld [vmem:[%s1471_s5 + $0x38] sm:$0xff] }
   0x8   :  { %431 = vmatpush.bf16.msra.mxu3 %v1062_v0  ;;  %v1061_v1 = vld [vmem:[%s1471_s5 + $0x30] sm:$0xff]  ;;  %v1060_v2 = vld [vmem:[%s1471_s5 + $0x28] sm:$0xff]  ;;  %v1059_v3 = vld [vmem:[%s1471_s5 + $0x20] sm:$0xff] }
   0x9   :  { %249 = vmatpush.bf16.msra.mxu1 %v1053_v24  ;;  %v1284_v4 = vld [vmem:[%s1470_s2 + $0x10] sm:$0xff]  ;;  %v1092_v11 = vld [vmem:[%s1469_s4] ss:$0 sm:$0xff] }
   0xa   :  { %65 = vperm.xlu1 %1090, %v48_v5   ;;  %59 = vperm.xlu0 %1089, %v46_v6   ;;  %v1291_v5 = vld [vmem:[%s1470_s2 + $0x18] sm:$0xff]  ;;  %v1065_v0 = vld [vmem:[%s1473_s7 + $0x10] sm:$0xff] }
   0xb   :  { %v1058_v6 = vld [vmem:[%s1471_s5 + $0x18] sm:$0xff] }
   0xc   :  { %71 = vperm.xlu2 %1091, %v50_v7   ;;  %432 = vmatpush.bf16.msra.mxu3 %v1061_v1  ;;  %v1057_v7 = vld [vmem:[%s1471_s5 + $0x10] sm:$0xff]  ;;  %v1064_v1 = vld [vmem:[%s1473_s7 + $0x8] sm:$0xff] }
   0xd   :  { %250 = vmatpush.bf16.msra.mxu1 %v1052_v26 }
  0x10   :  { %433 = vmatpush.bf16.msra.mxu3 %v1060_v2  ;;  %v1063_v2 = vld [vmem:[%s1473_s7] sm:$0xff] }
  0x11   :  { %251 = vmatpush.bf16.msra.mxu1 %v1051_v28 }
  0x12   :  { %77 = vperm.xlu1 %1090, %v52_v8   ;;  %74 = vperm.xlu0 %1089, %v51_v9   ;;  %v1056_v8 = vld [vmem:[%s1471_s5 + $0x8] sm:$0xff]  ;;  %v1055_v9 = vld [vmem:[%s1471_s5] sm:$0xff] }
  0x14   :  { %434 = vmatpush.bf16.msra.mxu3 %v1059_v3 }
  0x15   :  { %252 = vmatpush.bf16.msra.mxu1 %v1050_v29 }
  0x18   :  { %435 = vmatpush.bf16.msra.mxu3 %v1058_v6 }
  0x19   :  { %253 = vmatpush.bf16.msra.mxu1 %v1049_v35 }
  0x1c   :  { %436 = vmatpush.bf16.msra.mxu3 %v1057_v7 }
  0x1d   :  { %254 = vmatpush.bf16.msra.mxu1 %v1048_v36 }
  0x20   :  { %437 = vmatpush.bf16.msra.mxu3 %v1056_v8 }
  0x21   :  { %255 = vmatpush.bf16.msra.mxu1 %v1047_v37 }
  0x24   :  { %438 = vmatpush.bf16.msra.mxu3 %v1055_v9 }
  0x5e   :  { %v69_v22 = vpop.permute.xlu2 %68 }
  0x5f   :  { %vm83_vm5 = vcmp.eq.s32.totalorder %v69_v22, %v54_v12 }
  0x60   :  { %v847_v25 = vsel %vm83_vm5, 1.0, %v1098_v14 }
  0x66   :  { %v72_v27 = vpop.permute.xlu2 %71 }
  0x67   :  { %vm84_vm6 = vcmp.eq.s32.totalorder %v72_v27, %v54_v12 }
  0x68   :  { %v848_v30 = vsel %vm84_vm6, 1.0, %v1098_v14 }
  0x74   :  { %v57_v13 = vpop.permute.xlu0 %56  ;;  %v63_v18 = vpop.permute.xlu1 %62 }
  0x75   :  { %vm79_vm1 = vcmp.eq.s32.totalorder %v57_v13, %v54_v12  ;;  %vm81_vm3 = vcmp.eq.s32.totalorder %v63_v18, %v54_v12 }
  0x76   :  { %v843_v15 = vsel %vm79_vm1, 1.0, %v1098_v14  ;;  %v845_v19 = vsel %vm81_vm3, 1.0, %v1098_v14 }
  0x77   :  { %851 = vmatmul.msk.f32.vlgmr.msra.gmra.mxu0 %vm105_vm0, %v843_v15 }
  0x7c   :  { %v60_v16 = vpop.permute.xlu0 %59  ;;  %v66_v20 = vpop.permute.xlu1 %65 }
  0x7d   :  { %vm80_vm2 = vcmp.eq.s32.totalorder %v60_v16, %v54_v12  ;;  %vm82_vm4 = vcmp.eq.s32.totalorder %v66_v20, %v54_v12 }
  0x7e   :  { %v844_v17 = vsel %vm80_vm2, 1.0, %v1098_v14  ;;  %v846_v21 = vsel %vm82_vm4, 1.0, %v1098_v14 }
  0x7f   :  { %852 = vmatmul.msk.f32.gmra.mxu0 %vm105_vm0, %v844_v17 }
  0x84   :  { %v75_v31 = vpop.permute.xlu0 %74  ;;  %v78_v33 = vpop.permute.xlu1 %77 }
  0x85   :  { %vm85_vm7 = vcmp.eq.s32.totalorder %v75_v31, %v54_v12  ;;  %vm86_vm8 = vcmp.eq.s32.totalorder %v78_v33, %v54_v12 }
  0x86   :  { %v849_v32 = vsel %vm85_vm7, 1.0, %v1098_v14  ;;  %v850_v34 = vsel %vm86_vm8, 1.0, %v1098_v14 }
  0x87   :  { %853 = vmatmul.msk.f32.gmra.mxu0 %vm105_vm0, %v845_v19 }
  0x8f   :  { %854 = vmatmul.msk.f32.gmra.mxu0 %vm105_vm0, %v846_v21 }
  0x97   :  { %855 = vmatmul.msk.f32.gmra.mxu0 %vm105_vm0, %v847_v25 }
  0x9f   :  { %856 = vmatmul.msk.f32.gmra.mxu0 %vm105_vm0, %v848_v30 }
  0xa7   :  { %857 = vmatmul.msk.f32.gmra.mxu0 %vm105_vm0, %v849_v32 }
  0xaf   :  { %858 = vmatmul.msk.f32.gmra.mxu0 %vm105_vm0, %v850_v34 }
  0xf4   :  { %v1231_v38 = vpop.f32.mrf.mxu0 }
  0xfc   :  { %v1233_v39 = vpop.f32.mrf.mxu0 }
  0xfd   :  { %v196_v40 = vpack.c.bf16 %v1233_v39, %v1231_v38 }
  0xff   :  { %256 = vmatmul.bf16.vlgmr.msra.gmra.mxu1 %v196_v40 }
 0x104   :  { %v1237_v41 = vpop.f32.mrf.mxu0 }
 0x10c   :  { %v1239_v42 = vpop.f32.mrf.mxu0 }
 0x10d   :  { %v197_v43 = vpack.c.bf16 %v1239_v42, %v1237_v41 }
 0x10f   :  { %261 = vmatmul.bf16.gmra.mxu1 %v197_v43 }
 0x114   :  { %v1243_v44 = vpop.f32.mrf.mxu0 }
 0x11c   :  { %v1245_v45 = vpop.f32.mrf.mxu0 }
 0x11d   :  { %v198_v46 = vpack.c.bf16 %v1245_v45, %v1243_v44 }
 0x11f   :  { %266 = vmatmul.bf16.gmra.mxu1 %v198_v46 }
 0x124   :  { %v1249_v47 = vpop.f32.mrf.mxu0 }
 0x12c   :  { %v1251_v48 = vpop.f32.mrf.mxu0 }
 0x12d   :  { %v199_v49 = vpack.c.bf16 %v1251_v48, %v1249_v47 }
 0x12f   :  { %271 = vmatmul.bf16.gmra.mxu1 %v199_v49 }
 0x17c   :  { %v257_v50 = vpop.f32.mrf.mxu1 }
 0x184   :  { %v259_v51 = vpop.f32.mrf.mxu1 }
 0x185   :  { %v277_v61 = vpack.c.bf16 %v259_v51, %v257_v50 }
 0x18c   :  { %v262_v52 = vpop.f32.mrf.mxu1 }
 0x194   :  { %v264_v53 = vpop.f32.mrf.mxu1 }
 0x195   :  { %v278_v60 = vpack.c.bf16 %v264_v53, %v262_v52 }
 0x19c   :  { %v267_v54 = vpop.f32.mrf.mxu1 }
 0x1a4   :  { %v269_v55 = vpop.f32.mrf.mxu1 }
 0x1a5   :  { %v279_v59 = vpack.c.bf16 %v269_v55, %v267_v54 }
 0x1ac   :  { %v272_v56 = vpop.f32.mrf.mxu1 }
 0x1b4   :  { %v274_v57 = vpop.f32.mrf.mxu1 }
 0x1b5   :  { %v280_v58 = vpack.c.bf16 %v274_v57, %v272_v56 }
 0x1b7   :  { %321 = vmatpush.bf16.msra.mxu2 %v280_v58 }
 0x1bb   :  { %322 = vmatpush.bf16.msra.mxu2 %v279_v59  ;;  %v1070_v59 = vld [vmem:[%s1473_s7 + $0x38] sm:$0xff] }
 0x1bf   :  { %323 = vmatpush.bf16.msra.mxu2 %v278_v60  ;;  %v1069_v60 = vld [vmem:[%s1473_s7 + $0x30] sm:$0xff] }
 0x1c3   :  { %324 = vmatpush.bf16.msra.mxu2 %v277_v61  ;;  %v1068_v61 = vld [vmem:[%s1473_s7 + $0x28] sm:$0xff] }
 0x1c6   :  { %907 = vmatmul.msk.bf16.vlgmr.msra.gmra.mxu2 %vm304_vm9, %v1258_v62 }
 0x1c7   :  { %584 = vmatpush.bf16.msrb.mxu2 %v1070_v59 }
 0x1cb   :  { %585 = vmatpush.bf16.msrb.mxu2 %v1069_v60 }
 0x1cf   :  { %586 = vmatpush.bf16.msrb.mxu2 %v1068_v61 }
 0x1d6   :  { %908 = vmatmul.msk.bf16.gmra.mxu2 %vm304_vm9, %v1265_v63 }
 0x1e6   :  { %909 = vmatmul.msk.bf16.gmra.mxu2 %vm304_vm9, %v1284_v4 }
 0x1f6   :  { %910 = vmatmul.msk.bf16.gmra.mxu2 %vm304_vm9, %v1291_v5 }
 0x249   :  { %v326_v10 = vpop.f32.mrf.mxu2 }
 0x24a   :  { %v327_v12 = vadd.f32 %v1092_v11, %v326_v10 }
 0x24c   :  { %v346_v14 = vmax.f32 %v327_v12, 0.0 }
 0x24e   :  { %v1311_v17 = vadd.f32 %v346_v14, %v1231_v38 }
 0x251   :  { %v328_v13 = vpop.f32.mrf.mxu2 }
 0x252   :  { %v329_v15 = vadd.f32 %v1092_v11, %v328_v13 }
 0x254   :  { %v347_v16 = vmax.f32 %v329_v15, 0.0 }
 0x256   :  { %v1314_v18 = vadd.f32 %v347_v16, %v1233_v39 }
 0x258   :  { %v379_v19 = vpack.c.bf16 %v1314_v18, %v1311_v17 }
 0x259   :  { %v331_v20 = vpop.f32.mrf.mxu2 }
 0x25a   :  { %439 = vmatmul.bf16.vlgmr.msra.gmra.mxu3 %v379_v19  ;;  %v332_v21 = vadd.f32 %v1092_v11, %v331_v20 }
 0x25c   :  { %v348_v23 = vmax.f32 %v332_v21, 0.0 }
 0x25e   :  { %v1319_v26 = vadd.f32 %v348_v23, %v1237_v41 }
 0x261   :  { %v333_v22 = vpop.f32.mrf.mxu2 }
 0x262   :  { %v334_v24 = vadd.f32 %v1092_v11, %v333_v22 }
 0x264   :  { %v349_v25 = vmax.f32 %v334_v24, 0.0 }
 0x266   :  { %v1322_v27 = vadd.f32 %v349_v25, %v1239_v42 }
 0x268   :  { %v380_v28 = vpack.c.bf16 %v1322_v27, %v1319_v26 }
 0x269   :  { %v336_v29 = vpop.f32.mrf.mxu2 }
 0x26a   :  { %444 = vmatmul.bf16.gmra.mxu3 %v380_v28  ;;  %v337_v30 = vadd.f32 %v1092_v11, %v336_v29 }
 0x26c   :  { %v350_v32 = vmax.f32 %v337_v30, 0.0 }
 0x26e   :  { %v1327_v35 = vadd.f32 %v350_v32, %v1243_v44 }
 0x271   :  { %v338_v31 = vpop.f32.mrf.mxu2 }
 0x272   :  { %v339_v33 = vadd.f32 %v1092_v11, %v338_v31  ;;  %v1075_v31 = vld [vmem:[%s1475_s9 + $0x20] sm:$0xff] }
 0x274   :  { %v351_v34 = vmax.f32 %v339_v33, 0.0 }
 0x276   :  { %v1330_v36 = vadd.f32 %v351_v34, %v1245_v45 }
 0x278   :  { %v381_v37 = vpack.c.bf16 %v1330_v36, %v1327_v35 }
 0x279   :  { %v341_v38 = vpop.f32.mrf.mxu2 }
 0x27a   :  { %449 = vmatmul.bf16.gmra.mxu3 %v381_v37  ;;  %v342_v39 = vadd.f32 %v1092_v11, %v341_v38 }
 0x27c   :  { %v352_v41 = vmax.f32 %v342_v39, 0.0 }
 0x27e   :  { %v1335_v46 = vadd.f32 %v352_v41, %v1249_v47 }
 0x281   :  { %v343_v40 = vpop.f32.mrf.mxu2 }
 0x282   :  { %v344_v42 = vadd.f32 %v1092_v11, %v343_v40 }
 0x284   :  { %v353_v43 = vmax.f32 %v344_v42, 0.0 }
 0x286   :  { %v1338_v49 = vadd.f32 %v353_v43, %v1251_v48 }
 0x288   :  { %v382_v44 = vpack.c.bf16 %v1338_v49, %v1335_v46 }
 0x28a   :  { %454 = vmatmul.bf16.gmra.mxu3 %v382_v44 }
 0x2dd   :  { %v440_v45 = vpop.f32.mrf.mxu3 }
 0x2e5   :  { %v442_v50 = vpop.f32.mrf.mxu3 }
 0x2e6   :  { %v460_v48 = vpack.c.bf16 %v442_v50, %v440_v45  ;;  %v1072_v50 = vld [vmem:[%s1475_s9 + $0x8] sm:$0xff] }
 0x2ed   :  { %v445_v51 = vpop.f32.mrf.mxu3 }
 0x2f5   :  { %v447_v52 = vpop.f32.mrf.mxu3 }
 0x2f6   :  { %v461_v47 = vpack.c.bf16 %v447_v52, %v445_v51  ;;  %v1094_v51 = vld [vmem:[%s1474_s8] ss:$0 sm:$0xff] }
 0x2fd   :  { %v450_v53 = vpop.f32.mrf.mxu3 }
 0x305   :  { %v452_v54 = vpop.f32.mrf.mxu3 }
 0x306   :  { %v462_v58 = vpack.c.bf16 %v452_v54, %v450_v53 }
 0x30d   :  { %v455_v55 = vpop.f32.mrf.mxu3 }
 0x315   :  { %v457_v56 = vpop.f32.mrf.mxu3 }
 0x316   :  { %v463_v57 = vpack.c.bf16 %v457_v56, %v455_v55 }
 0x318   :  { %471 = vmatpush.bf16.msrb.mxu0 %v463_v57 }
 0x31c   :  { %472 = vmatpush.bf16.msrb.mxu0 %v462_v58 }
 0x320   :  { %473 = vmatpush.bf16.msrb.mxu0 %v461_v47 }
 0x324   :  { %474 = vmatpush.bf16.msrb.mxu0 %v460_v48 }
 0x327   :  { %943 = vmatmul.msk.bf16.vlgmr.msrb.gmra.mxu0 %vm304_vm9, %v1258_v62  ;;  %v1067_v62 = vld [vmem:[%s1473_s7 + $0x20] sm:$0xff] }
 0x328   :  { %587 = vmatpush.bf16.msrb.mxu2 %v1067_v62 }
 0x337   :  { %944 = vmatmul.msk.bf16.gmra.mxu0 %vm304_vm9, %v1265_v63  ;;  %v1066_v63 = vld [vmem:[%s1473_s7 + $0x18] sm:$0xff] }
 0x338   :  { %588 = vmatpush.bf16.msrb.mxu2 %v1066_v63  ;;  %v1086_v63 = vld [vmem:[%s1477_s11 + $0x38] sm:$0xff] }
 0x339   :  { %802 = vmatpush.bf16.msrb.mxu3 %v1086_v63 }
 0x33c   :  { %589 = vmatpush.bf16.msrb.mxu2 %v1065_v0 }
 0x340   :  { %590 = vmatpush.bf16.msrb.mxu2 %v1064_v1  ;;  %v1085_v1 = vld [vmem:[%s1477_s11 + $0x30] sm:$0xff] }
 0x341   :  { %803 = vmatpush.bf16.msrb.mxu3 %v1085_v1 }
 0x344   :  { %591 = vmatpush.bf16.msrb.mxu2 %v1063_v2  ;;  %v1084_v2 = vld [vmem:[%s1477_s11 + $0x28] sm:$0xff] }
 0x345   :  { %804 = vmatpush.bf16.msrb.mxu3 %v1084_v2 }
 0x347   :  { %945 = vmatmul.msk.bf16.gmra.mxu0 %vm304_vm9, %v1284_v4  ;;  %v1093_v4 = vld [vmem:[%s1472_s6] ss:$0 sm:$0xff] }
 0x357   :  { %946 = vmatmul.msk.bf16.gmra.mxu0 %vm304_vm9, %v1291_v5 }
 0x3a4   :  { %v476_v3 = vpop.f32.mrf.mxu0 }
 0x3a5   :  { %v477_v5 = vadd.f32 %v1093_v4, %v476_v3 }
 0x3a7   :  { %v496_v7 = vmax.f32 %v477_v5, 0.0 }
 0x3a9   :  { %v504_v10 = vadd.f32 %v496_v7, %v1311_v17  ;;  %v1078_v17 = vld [vmem:[%s1475_s9 + $0x38] sm:$0xff] }
 0x3aa   :  { %693 = vmatpush.bf16.msrb.mxu1 %v1078_v17 }
 0x3ac   :  { %v478_v6 = vpop.f32.mrf.mxu0 }
 0x3ad   :  { %v479_v8 = vadd.f32 %v1093_v4, %v478_v6  ;;  %v1083_v6 = vld [vmem:[%s1477_s11 + $0x20] sm:$0xff] }
 0x3ae   :  { %805 = vmatpush.bf16.msrb.mxu3 %v1083_v6 }
 0x3af   :  { %v497_v9 = vmax.f32 %v479_v8, 0.0 }
 0x3b1   :  { %v505_v11 = vadd.f32 %v497_v9, %v1314_v18  ;;  %v1077_v18 = vld [vmem:[%s1475_s9 + $0x30] sm:$0xff] }
 0x3b2   :  { %694 = vmatpush.bf16.msrb.mxu1 %v1077_v18 }
 0x3b3   :  { %v529_v12 = vpack.c.bf16 %v505_v11, %v504_v10 }
 0x3b4   :  { %v481_v13 = vpop.f32.mrf.mxu0 }
 0x3b5   :  { %592 = vmatmul.bf16.vlgmr.msrb.gmra.mxu2 %v529_v12  ;;  %v482_v14 = vadd.f32 %v1093_v4, %v481_v13 }
 0x3b7   :  { %v498_v16 = vmax.f32 %v482_v14, 0.0 }
 0x3b9   :  { %v506_v21 = vadd.f32 %v498_v16, %v1319_v26  ;;  %v1076_v26 = vld [vmem:[%s1475_s9 + $0x28] sm:$0xff] }
 0x3ba   :  { %695 = vmatpush.bf16.msrb.mxu1 %v1076_v26 }
 0x3bc   :  { %v483_v15 = vpop.f32.mrf.mxu0 }
 0x3bd   :  { %v484_v19 = vadd.f32 %v1093_v4, %v483_v15 }
 0x3be   :  { %696 = vmatpush.bf16.msrb.mxu1 %v1075_v31 }
 0x3bf   :  { %v499_v20 = vmax.f32 %v484_v19, 0.0  ;;  %v1082_v19 = vld [vmem:[%s1477_s11 + $0x18] sm:$0xff] }
 0x3c0   :  { %806 = vmatpush.bf16.msrb.mxu3 %v1082_v19 }
 0x3c1   :  { %v507_v22 = vadd.f32 %v499_v20, %v1322_v27  ;;  %v1081_v20 = vld [vmem:[%s1477_s11 + $0x10] sm:$0xff] }
 0x3c3   :  { %v530_v23 = vpack.c.bf16 %v507_v22, %v506_v21  ;;  %v1080_v21 = vld [vmem:[%s1477_s11 + $0x8] sm:$0xff]  ;;  %v1079_v22 = vld [vmem:[%s1477_s11] sm:$0xff] }
 0x3c4   :  { %v486_v24 = vpop.f32.mrf.mxu0  ;;  %807 = vmatpush.bf16.msrb.mxu3 %v1081_v20 }
 0x3c5   :  { %597 = vmatmul.bf16.gmra.mxu2 %v530_v23  ;;  %v487_v25 = vadd.f32 %v1093_v4, %v486_v24  ;;  %v1095_v24 = vld [vmem:[%s1476_s10] ss:$0 sm:$0xff] }
 0x3c7   :  { %v500_v27 = vmax.f32 %v487_v25, 0.0 }
 0x3c8   :  { %808 = vmatpush.bf16.msrb.mxu3 %v1080_v21 }
 0x3c9   :  { %v508_v32 = vadd.f32 %v500_v27, %v1327_v35  ;;  %v1074_v35 = vld [vmem:[%s1475_s9 + $0x18] sm:$0xff] }
 0x3ca   :  { %697 = vmatpush.bf16.msrb.mxu1 %v1074_v35 }
 0x3cc   :  { %v488_v28 = vpop.f32.mrf.mxu0  ;;  %809 = vmatpush.bf16.msrb.mxu3 %v1079_v22 }
 0x3cd   :  { %v489_v29 = vadd.f32 %v1093_v4, %v488_v28 }
 0x3cf   :  { %v501_v30 = vmax.f32 %v489_v29, 0.0 }
 0x3d1   :  { %v509_v33 = vadd.f32 %v501_v30, %v1330_v36  ;;  %v1073_v36 = vld [vmem:[%s1475_s9 + $0x10] sm:$0xff] }
 0x3d2   :  { %698 = vmatpush.bf16.msrb.mxu1 %v1073_v36 }
 0x3d3   :  { %v531_v34 = vpack.c.bf16 %v509_v33, %v508_v32 }
 0x3d4   :  { %v491_v37 = vpop.f32.mrf.mxu0 }
 0x3d5   :  { %602 = vmatmul.bf16.gmra.mxu2 %v531_v34  ;;  %v492_v38 = vadd.f32 %v1093_v4, %v491_v37 }
 0x3d6   :  { %699 = vmatpush.bf16.msrb.mxu1 %v1072_v50 }
 0x3d7   :  { %v502_v40 = vmax.f32 %v492_v38, 0.0 }
 0x3d9   :  { %v510_v43 = vadd.f32 %v502_v40, %v1335_v46  ;;  %v1071_v46 = vld [vmem:[%s1475_s9] sm:$0xff] }
 0x3da   :  { %700 = vmatpush.bf16.msrb.mxu1 %v1071_v46 }
 0x3dc   :  { %v493_v39 = vpop.f32.mrf.mxu0 }
 0x3dd   :  { %v494_v41 = vadd.f32 %v1093_v4, %v493_v39 }
 0x3df   :  { %v503_v42 = vmax.f32 %v494_v41, 0.0 }
 0x3e1   :  { %v511_v44 = vadd.f32 %v503_v42, %v1338_v49 }
 0x3e3   :  { %v532_v45 = vpack.c.bf16 %v511_v44, %v510_v43 }
 0x3e5   :  { %607 = vmatmul.bf16.gmra.mxu2 %v532_v45 }
 0x438   :  { %v593_v49 = vpop.f32.mrf.mxu2 }
 0x439   :  { %v594_v52 = vadd.f32 %v1094_v51, %v593_v49 }
 0x43b   :  { %v613_v55 = vmax.f32 %v594_v52, 0.0  ;;  %v1096_v52 = vld [vmem:[%s1478_s12] ss:$0 sm:$0xff] }
 0x440   :  { %v595_v53 = vpop.f32.mrf.mxu2 }
 0x441   :  { %v596_v54 = vadd.f32 %v1094_v51, %v595_v53 }
 0x443   :  { %v614_v56 = vmax.f32 %v596_v54, 0.0 }
 0x445   :  { %v638_v57 = vpack.c.bf16 %v614_v56, %v613_v55 }
 0x447   :  { %701 = vmatmul.bf16.vlgmr.msrb.gmra.mxu1 %v638_v57 }
 0x448   :  { %v598_v58 = vpop.f32.mrf.mxu2 }
 0x449   :  { %v599_v47 = vadd.f32 %v1094_v51, %v598_v58 }
 0x44b   :  { %v615_v60 = vmax.f32 %v599_v47, 0.0 }
 0x450   :  { %v600_v48 = vpop.f32.mrf.mxu2 }
 0x451   :  { %v601_v59 = vadd.f32 %v1094_v51, %v600_v48 }
 0x453   :  { %v616_v61 = vmax.f32 %v601_v59, 0.0 }
 0x455   :  { %v639_v62 = vpack.c.bf16 %v616_v61, %v615_v60 }
 0x457   :  { %706 = vmatmul.bf16.gmra.mxu1 %v639_v62 }
 0x458   :  { %v603_v0 = vpop.f32.mrf.mxu2 }
 0x459   :  { %v604_v3 = vadd.f32 %v1094_v51, %v603_v0 }
 0x45b   :  { %v617_v7 = vmax.f32 %v604_v3, 0.0 }
 0x460   :  { %v605_v4 = vpop.f32.mrf.mxu2 }
 0x461   :  { %v606_v5 = vadd.f32 %v1094_v51, %v605_v4 }
 0x463   :  { %v618_v8 = vmax.f32 %v606_v5, 0.0 }
 0x465   :  { %v640_v9 = vpack.c.bf16 %v618_v8, %v617_v7 }
 0x467   :  { %711 = vmatmul.bf16.gmra.mxu1 %v640_v9 }
 0x468   :  { %v608_v10 = vpop.f32.mrf.mxu2 }
 0x469   :  { %v609_v11 = vadd.f32 %v1094_v51, %v608_v10 }
 0x46b   :  { %v619_v14 = vmax.f32 %v609_v11, 0.0 }
 0x470   :  { %v610_v12 = vpop.f32.mrf.mxu2 }
 0x471   :  { %v611_v13 = vadd.f32 %v1094_v51, %v610_v12 }
 0x473   :  { %v620_v15 = vmax.f32 %v611_v13, 0.0 }
 0x475   :  { %v641_v16 = vpack.c.bf16 %v620_v15, %v619_v14 }
 0x477   :  { %716 = vmatmul.bf16.gmra.mxu1 %v641_v16 }
 0x4c4   :  { %v702_v23 = vpop.f32.mrf.mxu1 }
 0x4c5   :  { %v703_v17 = vadd.f32 %v1095_v24, %v702_v23 }
 0x4c7   :  { %v722_v26 = vmax.f32 %v703_v17, 0.0 }
 0x4cc   :  { %v704_v18 = vpop.f32.mrf.mxu1 }
 0x4cd   :  { %v705_v25 = vadd.f32 %v1095_v24, %v704_v18 }
 0x4cf   :  { %v723_v28 = vmax.f32 %v705_v25, 0.0 }
 0x4d1   :  { %v747_v27 = vpack.c.bf16 %v723_v28, %v722_v26 }
 0x4d3   :  { %810 = vmatmul.bf16.vlgmr.msrb.gmra.mxu3 %v747_v27 }
 0x4d4   :  { %v707_v29 = vpop.f32.mrf.mxu1 }
 0x4d5   :  { %v708_v30 = vadd.f32 %v1095_v24, %v707_v29 }
 0x4d7   :  { %v724_v33 = vmax.f32 %v708_v30, 0.0 }
 0x4dc   :  { %v709_v31 = vpop.f32.mrf.mxu1 }
 0x4dd   :  { %v710_v32 = vadd.f32 %v1095_v24, %v709_v31 }
 0x4df   :  { %v725_v34 = vmax.f32 %v710_v32, 0.0 }
 0x4e1   :  { %v748_v37 = vpack.c.bf16 %v725_v34, %v724_v33 }
 0x4e3   :  { %815 = vmatmul.bf16.gmra.mxu3 %v748_v37 }
 0x4e4   :  { %v712_v38 = vpop.f32.mrf.mxu1 }
 0x4e5   :  { %v713_v39 = vadd.f32 %v1095_v24, %v712_v38 }
 0x4e7   :  { %v726_v42 = vmax.f32 %v713_v39, 0.0 }
 0x4ec   :  { %v714_v40 = vpop.f32.mrf.mxu1 }
 0x4ed   :  { %v715_v41 = vadd.f32 %v1095_v24, %v714_v40 }
 0x4ef   :  { %v727_v43 = vmax.f32 %v715_v41, 0.0 }
 0x4f1   :  { %v749_v44 = vpack.c.bf16 %v727_v43, %v726_v42 }
 0x4f3   :  { %820 = vmatmul.bf16.gmra.mxu3 %v749_v44 }
 0x4f4   :  { %v717_v45 = vpop.f32.mrf.mxu1 }
 0x4f5   :  { %v718_v35 = vadd.f32 %v1095_v24, %v717_v45 }
 0x4f7   :  { %v728_v46 = vmax.f32 %v718_v35, 0.0 }
 0x4fc   :  { %v719_v36 = vpop.f32.mrf.mxu1 }
 0x4fd   :  { %v720_v50 = vadd.f32 %v1095_v24, %v719_v36 }
 0x4ff   :  { %v729_v49 = vmax.f32 %v720_v50, 0.0 }
 0x501   :  { %v750_v51 = vpack.c.bf16 %v729_v49, %v728_v46 }
 0x503   :  { %825 = vmatmul.bf16.gmra.mxu3 %v750_v51 }
 0x556   :  { %v811_v53 = vpop.f32.mrf.mxu3 }
 0x557   :  { %v812_v54 = vadd.f32 %v1096_v52, %v811_v53 }
 0x559   :  { %831 = vst [vmem:[%s1479_s13] sm:$0xff] %v812_v54 }
 0x55e   :  { %v813_v55 = vpop.f32.mrf.mxu3 }
 0x55f   :  { %v814_v56 = vadd.f32 %v1096_v52, %v813_v55 }
 0x561   :  { %832 = vst [vmem:[%s1479_s13 + $0x8] sm:$0xff] %v814_v56 }
 0x566   :  { %v816_v57 = vpop.f32.mrf.mxu3 }
 0x567   :  { %v817_v58 = vadd.f32 %v1096_v52, %v816_v57 }
 0x569   :  { %833 = vst [vmem:[%s1479_s13 + $0x10] sm:$0xff] %v817_v58 }
 0x56e   :  { %v818_v47 = vpop.f32.mrf.mxu3 }
 0x56f   :  { %v819_v48 = vadd.f32 %v1096_v52, %v818_v47 }
 0x571   :  { %834 = vst [vmem:[%s1479_s13 + $0x18] sm:$0xff] %v819_v48 }
 0x576   :  { %v821_v59 = vpop.f32.mrf.mxu3 }
 0x577   :  { %v822_v60 = vadd.f32 %v1096_v52, %v821_v59 }
 0x579   :  { %835 = vst [vmem:[%s1479_s13 + $0x20] sm:$0xff] %v822_v60 }
 0x57e   :  { %v823_v61 = vpop.f32.mrf.mxu3 }
 0x57f   :  { %v824_v62 = vadd.f32 %v1096_v52, %v823_v61 }
 0x581   :  { %836 = vst [vmem:[%s1479_s13 + $0x28] sm:$0xff] %v824_v62 }
 0x586   :  { %v826_v63 = vpop.f32.mrf.mxu3 }
 0x587   :  { %v827_v0 = vadd.f32 %v1096_v52, %v826_v63 }
 0x589   :  { %837 = vst [vmem:[%s1479_s13 + $0x30] sm:$0xff] %v827_v0 }
 0x58e   :  { %v828_v1 = vpop.f32.mrf.mxu3 }
 0x58f   :  { %v829_v2 = vadd.f32 %v1096_v52, %v828_v1 }
 0x591   :  { %838 = vst [vmem:[%s1479_s13 + $0x38] sm:$0xff] %v829_v2 }

</bundles_post_ra>
